<compile_context>
chip_gen: v6e
topology: v6e:2x2x1
jax: 0.10.0
libtpu: 0.0.40
codegen_flags: <defaults>
</compile_context>

<pallas_src>
import math
import numpy as np
import jax
import jax.numpy as jnp
from jax.experimental import pallas as pl
from jax.experimental.pallas import tpu as pltpu


# ----------------------------- configuration --------------------------------
B = 8            # batch (demo size; kernel tiles any batch that is a multiple of 8)
L = 16           # latent_size
C = 8            # context (z) size
H = 32           # hidden_size
FLOW_DEPTH = 2   # flow_depth
FLOW_STD = 0.5   # flow_std
ACTIVATION = "tanh"
LOG_2PI = math.log(2.0 * math.pi)
LOG_FLOW_STD = math.log(FLOW_STD)
INV_FLOW_STD = 1.0 / FLOW_STD

# Packed-weight buffer layout (per flow layer), all sections 8-row aligned:
#   rows [ROW_W1,  ROW_W1+L)   : W1   (L, H)   masked, R^k folded into rows
#   rows [ROW_WC,  ROW_WC+C)   : Wc   (C, H)   context projection (never permuted)
#   rows [ROW_BIN, ROW_BIN+8)  : b1   (1, H)
#   rows [ROW_WOUT,ROW_WOUT+H) : [Wm | Ws] (H, 2L)  masked, R^k folded into cols
#   rows [ROW_BOUT,ROW_BOUT+8) : [bm | bs] (1, 2L)
_ru8 = lambda n: (n + 7) // 8 * 8
ROW_W1 = 0
ROW_WC = _ru8(L)
ROW_BIN = ROW_WC + _ru8(C)
ROW_WOUT = ROW_BIN + 8
ROW_BOUT = ROW_WOUT + _ru8(H)
PACK_ROWS = ROW_BOUT + 8               # 72
PACK_COLS = max(H, 2 * L)              # 32


# ------------------------------ MADE masks -----------------------------------
def made_masks(latent, hidden):
    """Standard MADE masks. hidden_degrees='equal' (evenly cycled 1..L-1)."""
    in_deg = np.arange(1, latent + 1)
    hid_deg = (np.arange(hidden) % max(latent - 1, 1)) + 1
    out_deg = np.arange(1, latent + 1)
    mask1 = (hid_deg[None, :] >= in_deg[:, None]).astype(np.float32)   # (L, H)
    mask2 = (out_deg[None, :] > hid_deg[:, None]).astype(np.float32)   # (H, L)
    return mask1, mask2


# ------------------------------- parameters ----------------------------------
def init_params(key):
    """Deterministic raw parameters, MADE masks pre-applied (masked linear == W*mask)."""
    mask1, mask2 = made_masks(L, H)
    ks = jax.random.split(key, 5)

    def lin(k, shape, fan_in):
        return jax.random.normal(k, shape, jnp.float32) / math.sqrt(fan_in)

    w1 = lin(ks[0], (FLOW_DEPTH, L, H), L) * jnp.asarray(mask1)[None]   # nu -> hidden (masked)
    wc = lin(ks[1], (FLOW_DEPTH, C, H), C)                              # context -> hidden
    b1 = lin(ks[2], (FLOW_DEPTH, 1, H), H)
    wm = lin(ks[3], (FLOW_DEPTH, H, L), H) * jnp.asarray(mask2)[None]   # hidden -> mean (masked)
    bm = jnp.zeros((FLOW_DEPTH, 1, L), jnp.float32)
    ws = lin(ks[4], (FLOW_DEPTH, H, L), H) * jnp.asarray(mask2)[None]   # hidden -> log-scale (masked)
    bs = jnp.zeros((FLOW_DEPTH, 1, L), jnp.float32)
    return w1, wc, b1, wm, bm, ws, bs


def pack_params(params):
    """Offline prep (host side, not in the kernel): fold the Reverse permutation
    into the weights and pack everything into one (FLOW_DEPTH, PACK_ROWS,
    PACK_COLS) f32 buffer -> a single weight DMA for the whole call."""
    w1, wc, b1, wm, bm, ws, bs = params

    def put(block, row, mat):
        r, c = mat.shape
        return block.at[row:row + r, 0:c].set(mat)

    blocks = []
    for k in range(FLOW_DEPTH):
        w1_k, wc_k, b1_k = w1[k], wc[k], b1[k]
        wm_k, bm_k, ws_k, bs_k = wm[k], bm[k], ws[k], bs[k]
        if k % 2 == 1:
            # Fold R^k (cumulative Reverse) into layer k: permute W1 rows and
            # the output columns of Wm/Ws/bm/bs.  Exact (it's a permutation).
            w1_k = jnp.flip(w1_k, axis=0)
            wm_k, bm_k = jnp.flip(wm_k, axis=1), jnp.flip(bm_k, axis=1)
            ws_k, bs_k = jnp.flip(ws_k, axis=1), jnp.flip(bs_k, axis=1)
        w_out = jnp.concatenate([wm_k, ws_k], axis=1)   # (H, 2L) = [Wm | Ws]
        b_out = jnp.concatenate([bm_k, bs_k], axis=1)   # (1, 2L) = [bm | bs]
        blk = jnp.zeros((PACK_ROWS, PACK_COLS), jnp.float32)
        blk = put(blk, ROW_W1, w1_k)
        blk = put(blk, ROW_WC, wc_k)
        blk = put(blk, ROW_BIN, b1_k)
        blk = put(blk, ROW_WOUT, w_out)
        blk = put(blk, ROW_BOUT, b_out)
        blocks.append(blk)
    return jnp.stack(blocks)   # (FLOW_DEPTH, PACK_ROWS, PACK_COLS)


# --------------------------------- kernel ------------------------------------
def _act(x):
    if ACTIVATION == "tanh":
        return jnp.tanh(x)
    return jnp.maximum(x, 0.0)


def flow_kernel(nu_ref, z_ref, wb_ref, nu0_ref, logr_ref):
    # nu_ref: (TB, L), z_ref: (TB, C), wb_ref: (FLOW_DEPTH, PACK_ROWS, PACK_COLS)
    TB = nu_ref.shape[0]
    nu = nu_ref[...]                                   # running latent, Y-frame (reversals folded)
    zc = z_ref[...]                                    # context, never permuted
    LR = jnp.zeros((TB, L), jnp.float32)               # -sum_k tanh(s_k)

    for k in range(FLOW_DEPTH):   # depth=2: static unroll; use fori_loop(unroll=True) if depth > ~4
        w1 = wb_ref[k, ROW_W1:ROW_W1 + L, 0:H]             # (L, H)   masked, R^k folded
        wc = wb_ref[k, ROW_WC:ROW_WC + C, 0:H]             # (C, H)
        b1 = wb_ref[k, ROW_BIN:ROW_BIN + 1, 0:H]           # (1, H)
        wo = wb_ref[k, ROW_WOUT:ROW_WOUT + H, 0:2 * L]     # (H, 2L)  [Wm | Ws], R^k folded
        bo = wb_ref[k, ROW_BOUT:ROW_BOUT + 1, 0:2 * L]     # (1, 2L)

        h = _act(jnp.dot(nu, w1, preferred_element_type=jnp.float32)
                 + jnp.dot(zc, wc, preferred_element_type=jnp.float32)
                 + b1)                                                      # (TB, H)
        ms = jnp.dot(h, wo, preferred_element_type=jnp.float32) + bo       # (TB, 2L) = [m | s]
        # tanh is evaluated on all 2L lanes; only the s-half of the rolled
        # result is ever read (the m-half lanes of `t` are garbage by design).
        t = jnp.tanh(ms)
        s_t = pltpu.roll(t, shift=L, axis=1)[:, :L]        # tanh(s) onto lanes [0, L)  (XLU)
        m = ms[:, :L]                                      # mean
        nu = (nu - m) * (jnp.exp(-s_t) * INV_FLOW_STD)     # inverse affine transform
        LR = LR - s_t                                      # per-dim log-det accumulation

    base = -0.5 * nu * nu - 0.5 * LOG_2PI                  # Normal(0,1).log_prob(nu_0)
    nu0_ref[...] = nu
    logr_ref[...] = LR + base - FLOW_DEPTH * LOG_FLOW_STD


def _batch_tile(batch):
    """Fill the MXU M-dimension when the caller batches many rows; single tile
    otherwise (at the demo batch of 8 this yields grid=(1,))."""
    for tb in (512, 256, 128):
        if batch % tb == 0:
            return tb
    return batch


@jax.jit
def conditional_posterior_forward(nu_K, z, wb):
    batch = nu_K.shape[0]
    tb = _batch_tile(batch)
    grid = (batch // tb,)
    nu0, log_r = pl.pallas_call(
        flow_kernel,
        grid=grid,
        in_specs=[
            pl.BlockSpec((tb, L), lambda i: (i, 0)),
            pl.BlockSpec((tb, C), lambda i: (i, 0)),
            # constant block index -> weights DMA'd once, resident across batch tiles
            pl.BlockSpec((FLOW_DEPTH, PACK_ROWS, PACK_COLS), lambda i: (0, 0, 0)),
        ],
        out_specs=(
            pl.BlockSpec((tb, L), lambda i: (i, 0)),
            pl.BlockSpec((tb, L), lambda i: (i, 0)),
        ),
        out_shape=(jax.ShapeDtypeStruct((batch, L), jnp.float32),
                   jax.ShapeDtypeStruct((batch, L), jnp.float32)),
        # nu_K's HBM buffer is reused for nu_0 (truly in-place when the caller donates nu_K).
        input_output_aliases={0: 0},
        compiler_params=pltpu.CompilerParams(
            dimension_semantics=("parallel",)),   # batched callers use both v7x TCs
    )(nu_K, z, wb)
    if FLOW_DEPTH % 2 == 1:          # composed Reverse (identity for even flow_depth)
        nu0, log_r = nu0[:, ::-1], log_r[:, ::-1]
    zero = jnp.zeros((1,), jnp.float32)              # the module's `zero` buffer
    return nu0, zero, log_r
    # TODO(synk): initialize_scale (stateful r_nu_0.scale update + print) is not
    # part of forward and is not implemented.


# --------------------------- pure-JAX reference -------------------------------
def reference_forward(nu_K, z, params):
    w1, wc, b1, wm, bm, ws, bs = params
    dot = lambda a, b: jnp.dot(a, b, precision=jax.lax.Precision.HIGHEST)
    nu = nu_K
    logr = jnp.zeros_like(nu)
    for k in range(FLOW_DEPTH):
        h = _act(dot(nu, w1[k]) + dot(z, wc[k]) + b1[k])
        m = dot(h, wm[k]) + bm[k]
        log_sigma = jnp.tanh(dot(h, ws[k]) + bs[k]) + LOG_FLOW_STD
        nu = (nu - m) * jnp.exp(-log_sigma)
        logr = logr - log_sigma
        nu = nu[:, ::-1]
        logr = logr[:, ::-1]
    log_r_nu0 = -0.5 * nu * nu - 0.5 * LOG_2PI
    return nu, jnp.zeros((1,), jnp.float32), logr + log_r_nu0


# ----------------------------------- main -------------------------------------
if __name__ == "__main__":
    key = jax.random.PRNGKey(0)
    k_par, k_nu, k_z = jax.random.split(key, 3)

    params = init_params(k_par)
    wb = pack_params(params)
    nu_K = jax.random.normal(k_nu, (B, L), jnp.float32)
    z = jax.random.normal(k_z, (B, C), jnp.float32)

    nu0, zero, log_r = conditional_posterior_forward(nu_K, z, wb)
    jax.block_until_ready((nu0, zero, log_r))

    nu0_ref, _, log_r_ref = reference_forward(nu_K, z, params)
    assert nu0.shape == (B, L) and log_r.shape == (B, L) and zero.shape == (1,)
    np.testing.assert_allclose(np.asarray(nu0), np.asarray(nu0_ref),
                               rtol=1e-3, atol=1e-4)
    np.testing.assert_allclose(np.asarray(log_r), np.asarray(log_r_ref),
                               rtol=1e-3, atol=1e-4)
    print("KERNEL_OK")
</pallas_src>

<mosaic_0001>
module attributes {stable_mosaic.version = 11 : i64} {
  func.func @flow_kernel(%arg0: i32, %arg1: memref<8x16xf32, #tpu.memory_space<vmem>>, %arg2: memref<8x8xf32, #tpu.memory_space<vmem>>, %arg3: memref<2x72x32xf32, #tpu.memory_space<vmem>>, %arg4: memref<8x16xf32, #tpu.memory_space<vmem>>, %arg5: memref<8x16xf32, #tpu.memory_space<vmem>>) attributes {dimension_semantics = [#tpu.dimension_semantics<parallel>], iteration_bounds = array<i64: 1>, scalar_prefetch = 0 : i64, scratch_operands = 0 : i64, tpu.core_type = #tpu.core_type<tc>, window_params = [{transform_indices = @transform_0, window_bounds = array<i64: 8, 16>}, {transform_indices = @transform_1, window_bounds = array<i64: 8, 8>}, {pipeline_mode = #tpu.pipeline_mode<synchronous>, transform_indices = @transform_2, window_bounds = array<i64: 2, 72, 32>}, {transform_indices = @transform_3, window_bounds = array<i64: 8, 16>}, {transform_indices = @transform_4, window_bounds = array<i64: 8, 16>}]} {
    %c0 = arith.constant 0 : index
    %c0_0 = arith.constant 0 : index
    %0 = vector.load %arg1[%c0, %c0_0] : memref<8x16xf32, #tpu.memory_space<vmem>>, vector<8x16xf32>
    %c0_1 = arith.constant 0 : index
    %c0_2 = arith.constant 0 : index
    %1 = vector.load %arg2[%c0_1, %c0_2] : memref<8x8xf32, #tpu.memory_space<vmem>>, vector<8x8xf32>
    %cst = arith.constant 0.000000e+00 : f32
    %2 = vector.broadcast %cst : f32 to vector<8x16xf32>
    %c0_3 = arith.constant 0 : index
    %c0_4 = arith.constant 0 : index
    %c0_5 = arith.constant 0 : index
    %3 = vector.load %arg3[%c0_3, %c0_4, %c0_5] : memref<2x72x32xf32, #tpu.memory_space<vmem>>, vector<1x16x32xf32>
    %4 = vector.shape_cast %3 : vector<1x16x32xf32> to vector<16x32xf32>
    %c0_6 = arith.constant 0 : index
    %c16 = arith.constant 16 : index
    %c0_7 = arith.constant 0 : index
    %5 = vector.load %arg3[%c0_6, %c16, %c0_7] : memref<2x72x32xf32, #tpu.memory_space<vmem>>, vector<1x8x32xf32>
    %6 = vector.shape_cast %5 : vector<1x8x32xf32> to vector<8x32xf32>
    %c0_8 = arith.constant 0 : index
    %c24 = arith.constant 24 : index
    %c0_9 = arith.constant 0 : index
    %7 = vector.load %arg3[%c0_8, %c24, %c0_9] : memref<2x72x32xf32, #tpu.memory_space<vmem>>, vector<1x1x32xf32>
    %8 = vector.shape_cast %7 : vector<1x1x32xf32> to vector<1x32xf32>
    %c0_10 = arith.constant 0 : index
    %c32 = arith.constant 32 : index
    %c0_11 = arith.constant 0 : index
    %9 = vector.load %arg3[%c0_10, %c32, %c0_11] : memref<2x72x32xf32, #tpu.memory_space<vmem>>, vector<1x32x32xf32>
    %10 = vector.shape_cast %9 : vector<1x32x32xf32> to vector<32x32xf32>
    %c0_12 = arith.constant 0 : index
    %c64 = arith.constant 64 : index
    %c0_13 = arith.constant 0 : index
    %11 = vector.load %arg3[%c0_12, %c64, %c0_13] : memref<2x72x32xf32, #tpu.memory_space<vmem>>, vector<1x1x32xf32>
    %12 = vector.shape_cast %11 : vector<1x1x32xf32> to vector<1x32xf32>
    %cst_14 = arith.constant dense<0.000000e+00> : vector<8x32xf32>
    %13 = tpu.matmul %0, %4, %cst_14 {dimension_numbers = #tpu.dot_dimension_numbers<[1], [0], [0], [1], [0, 0, 1, 1], [], []>} : vector<8x16xf32>, vector<16x32xf32>, vector<8x32xf32> -> vector<8x32xf32>
    %cst_15 = arith.constant dense<0.000000e+00> : vector<8x32xf32>
    %14 = tpu.matmul %1, %6, %cst_15 {dimension_numbers = #tpu.dot_dimension_numbers<[1], [0], [0], [1], [0, 0, 1, 1], [], []>} : vector<8x8xf32>, vector<8x32xf32>, vector<8x32xf32> -> vector<8x32xf32>
    %15 = arith.addf %13, %14 : vector<8x32xf32>
    %16 = vector.broadcast %8 : vector<1x32xf32> to vector<8x32xf32>
    %17 = arith.addf %15, %16 : vector<8x32xf32>
    %18 = math.tanh %17 : vector<8x32xf32>
    %cst_16 = arith.constant dense<0.000000e+00> : vector<8x32xf32>
    %19 = tpu.matmul %18, %10, %cst_16 {dimension_numbers = #tpu.dot_dimension_numbers<[1], [0], [0], [1], [0, 0, 1, 1], [], []>} : vector<8x32xf32>, vector<32x32xf32>, vector<8x32xf32> -> vector<8x32xf32>
    %20 = vector.broadcast %12 : vector<1x32xf32> to vector<8x32xf32>
    %21 = arith.addf %19, %20 : vector<8x32xf32>
    %22 = math.tanh %21 : vector<8x32xf32>
    %c16_i32 = arith.constant 16 : i32
    %23 = tpu.dynamic_rotate %22 by %c16_i32 dim 1 : vector<8x32xf32>, i32 -> vector<8x32xf32>
    %24 = vector.extract_strided_slice %23 {offsets = [0, 0], sizes = [8, 16], strides = [1, 1]} : vector<8x32xf32> to vector<8x16xf32>
    %25 = vector.extract_strided_slice %21 {offsets = [0, 0], sizes = [8, 16], strides = [1, 1]} : vector<8x32xf32> to vector<8x16xf32>
    %26 = arith.subf %0, %25 : vector<8x16xf32>
    %cst_17 = arith.constant 0.000000e+00 : f32
    %27 = vector.broadcast %cst_17 : f32 to vector<8x16xf32>
    %28 = arith.subf %27, %24 : vector<8x16xf32>
    %29 = math.exp %28 : vector<8x16xf32>
    %cst_18 = arith.constant 2.000000e+00 : f32
    %30 = vector.broadcast %cst_18 : f32 to vector<8x16xf32>
    %31 = arith.mulf %29, %30 : vector<8x16xf32>
    %32 = arith.mulf %26, %31 : vector<8x16xf32>
    %33 = arith.subf %2, %24 : vector<8x16xf32>
    %c1 = arith.constant 1 : index
    %c0_19 = arith.constant 0 : index
    %c0_20 = arith.constant 0 : index
    %34 = vector.load %arg3[%c1, %c0_19, %c0_20] : memref<2x72x32xf32, #tpu.memory_space<vmem>>, vector<1x16x32xf32>
    %35 = vector.shape_cast %34 : vector<1x16x32xf32> to vector<16x32xf32>
    %c1_21 = arith.constant 1 : index
    %c16_22 = arith.constant 16 : index
    %c0_23 = arith.constant 0 : index
    %36 = vector.load %arg3[%c1_21, %c16_22, %c0_23] : memref<2x72x32xf32, #tpu.memory_space<vmem>>, vector<1x8x32xf32>
    %37 = vector.shape_cast %36 : vector<1x8x32xf32> to vector<8x32xf32>
    %c1_24 = arith.constant 1 : index
    %c24_25 = arith.constant 24 : index
    %c0_26 = arith.constant 0 : index
    %38 = vector.load %arg3[%c1_24, %c24_25, %c0_26] : memref<2x72x32xf32, #tpu.memory_space<vmem>>, vector<1x1x32xf32>
    %39 = vector.shape_cast %38 : vector<1x1x32xf32> to vector<1x32xf32>
    %c1_27 = arith.constant 1 : index
    %c32_28 = arith.constant 32 : index
    %c0_29 = arith.constant 0 : index
    %40 = vector.load %arg3[%c1_27, %c32_28, %c0_29] : memref<2x72x32xf32, #tpu.memory_space<vmem>>, vector<1x32x32xf32>
    %41 = vector.shape_cast %40 : vector<1x32x32xf32> to vector<32x32xf32>
    %c1_30 = arith.constant 1 : index
    %c64_31 = arith.constant 64 : index
    %c0_32 = arith.constant 0 : index
    %42 = vector.load %arg3[%c1_30, %c64_31, %c0_32] : memref<2x72x32xf32, #tpu.memory_space<vmem>>, vector<1x1x32xf32>
    %43 = vector.shape_cast %42 : vector<1x1x32xf32> to vector<1x32xf32>
    %cst_33 = arith.constant dense<0.000000e+00> : vector<8x32xf32>
    %44 = tpu.matmul %32, %35, %cst_33 {dimension_numbers = #tpu.dot_dimension_numbers<[1], [0], [0], [1], [0, 0, 1, 1], [], []>} : vector<8x16xf32>, vector<16x32xf32>, vector<8x32xf32> -> vector<8x32xf32>
    %cst_34 = arith.constant dense<0.000000e+00> : vector<8x32xf32>
    %45 = tpu.matmul %1, %37, %cst_34 {dimension_numbers = #tpu.dot_dimension_numbers<[1], [0], [0], [1], [0, 0, 1, 1], [], []>} : vector<8x8xf32>, vector<8x32xf32>, vector<8x32xf32> -> vector<8x32xf32>
    %46 = arith.addf %44, %45 : vector<8x32xf32>
    %47 = vector.broadcast %39 : vector<1x32xf32> to vector<8x32xf32>
    %48 = arith.addf %46, %47 : vector<8x32xf32>
    %49 = math.tanh %48 : vector<8x32xf32>
    %cst_35 = arith.constant dense<0.000000e+00> : vector<8x32xf32>
    %50 = tpu.matmul %49, %41, %cst_35 {dimension_numbers = #tpu.dot_dimension_numbers<[1], [0], [0], [1], [0, 0, 1, 1], [], []>} : vector<8x32xf32>, vector<32x32xf32>, vector<8x32xf32> -> vector<8x32xf32>
    %51 = vector.broadcast %43 : vector<1x32xf32> to vector<8x32xf32>
    %52 = arith.addf %50, %51 : vector<8x32xf32>
    %53 = math.tanh %52 : vector<8x32xf32>
    %c16_i32_36 = arith.constant 16 : i32
    %54 = tpu.dynamic_rotate %53 by %c16_i32_36 dim 1 : vector<8x32xf32>, i32 -> vector<8x32xf32>
    %55 = vector.extract_strided_slice %54 {offsets = [0, 0], sizes = [8, 16], strides = [1, 1]} : vector<8x32xf32> to vector<8x16xf32>
    %56 = vector.extract_strided_slice %52 {offsets = [0, 0], sizes = [8, 16], strides = [1, 1]} : vector<8x32xf32> to vector<8x16xf32>
    %57 = arith.subf %32, %56 : vector<8x16xf32>
    %cst_37 = arith.constant 0.000000e+00 : f32
    %58 = vector.broadcast %cst_37 : f32 to vector<8x16xf32>
    %59 = arith.subf %58, %55 : vector<8x16xf32>
    %60 = math.exp %59 : vector<8x16xf32>
    %cst_38 = arith.constant 2.000000e+00 : f32
    %61 = vector.broadcast %cst_38 : f32 to vector<8x16xf32>
    %62 = arith.mulf %60, %61 : vector<8x16xf32>
    %63 = arith.mulf %57, %62 : vector<8x16xf32>
    %64 = arith.subf %33, %55 : vector<8x16xf32>
    %cst_39 = arith.constant -5.000000e-01 : f32
    %65 = vector.broadcast %cst_39 : f32 to vector<8x16xf32>
    %66 = arith.mulf %65, %63 : vector<8x16xf32>
    %67 = arith.mulf %66, %63 : vector<8x16xf32>
    %cst_40 = arith.constant 0.918938517 : f32
    %68 = vector.broadcast %cst_40 : f32 to vector<8x16xf32>
    %69 = arith.subf %67, %68 : vector<8x16xf32>
    %c0_41 = arith.constant 0 : index
    %c0_42 = arith.constant 0 : index
    %70 = vector.load %arg4[%c0_41, %c0_42] : memref<8x16xf32, #tpu.memory_space<vmem>>, vector<8x16xf32>
    tpu.vector_store %arg4[%c0_41, %c0_42], %63 {strides = array<i32>} : memref<8x16xf32, #tpu.memory_space<vmem>>, vector<8x16xf32>,
    %71 = arith.addf %64, %69 : vector<8x16xf32>
    %cst_43 = arith.constant -1.38629436 : f32
    %72 = vector.broadcast %cst_43 : f32 to vector<8x16xf32>
    %73 = arith.subf %71, %72 : vector<8x16xf32>
    %c0_44 = arith.constant 0 : index
    %c0_45 = arith.constant 0 : index
    %74 = vector.load %arg5[%c0_44, %c0_45] : memref<8x16xf32, #tpu.memory_space<vmem>>, vector<8x16xf32>
    tpu.vector_store %arg5[%c0_44, %c0_45], %73 {strides = array<i32>} : memref<8x16xf32, #tpu.memory_space<vmem>>, vector<8x16xf32>,
    return
  }
  func.func @transform_0(%arg0: i32) -> (i32, i32) {
    %c0_i32 = arith.constant 0 : i32
    %c0_i32_0 = arith.constant 0 : i32
    return %arg0, %c0_i32 : i32, i32
  }
  func.func @transform_1(%arg0: i32) -> (i32, i32) {
    %c0_i32 = arith.constant 0 : i32
    %c0_i32_0 = arith.constant 0 : i32
    return %arg0, %c0_i32 : i32, i32
  }
  func.func @transform_2(%arg0: i32) -> (i32, i32, i32) {
    %c0_i32 = arith.constant 0 : i32
    %c0_i32_0 = arith.constant 0 : i32
    %c0_i32_1 = arith.constant 0 : i32
    %c0_i32_2 = arith.constant 0 : i32
    return %c0_i32, %c0_i32_0, %c0_i32_1 : i32, i32, i32
  }
  func.func @transform_3(%arg0: i32) -> (i32, i32) {
    %c0_i32 = arith.constant 0 : i32
    %c0_i32_0 = arith.constant 0 : i32
    return %arg0, %c0_i32 : i32, i32
  }
  func.func @transform_4(%arg0: i32) -> (i32, i32) {
    %c0_i32 = arith.constant 0 : i32
    %c0_i32_0 = arith.constant 0 : i32
    return %arg0, %c0_i32 : i32, i32
  }
}

</mosaic_0001>

<bundles_post_ra>
// kernel: conditional_posterior_forward.1
= control target key start
LH: loop header
LB: loop body
LE: loop exit
PB: predicated region body
PF: predicated region fallthrough
CT: control target
= control target key end

     0   :  { %vm28_vm0 = vcmask 64512   ;;  %v692_v2 = vmov 0.0   ;;  %vm693_vm1 = vmmov 0   ;;  %s841_s0 = inlined_call_operand.vmem [shape: f32[8,16], index: 0, kind: input, shape index: {}, may-alias: {0,3}]   ;;  %s842_s1 = inlined_call_operand.vmem [shape: f32[8,8], index: 1, kind: input, shape index: {}]   ;;  %s843_s2 = inlined_call_operand.vmem [shape: f32[2,72,32], index: 2, kind: input, shape index: {}]   ;;  %s844_s3 = inlined_call_operand.vmem [shape: f32[8,16], index: 3, kind: output, shape index: {0}, may-alias: {0,3}]   ;;  %s845_s4 = inlined_call_operand.hbm [shape: f32[8,16], index: 4, kind: output, shape index: {1}]  }
   0x1   :  { %v21_v0 = vld [vmem:[%s843_s2 + $0x10] sm:$0xff]  ;;  %v18_v1 = vld [vmem:[%s842_s1] sm:$0xff]  ;;  %606 = vmatprep.subr.mxu1 %v692_v2  ;;  %608 = vmatprep.mubr.msk.f32.mxu1 %vm693_vm1, %v692_v2  ;;  %v20_v3 = vld [vmem:[%s843_s2 + $0x8] sm:$0xff] }
   0x2   :  { %10 = vsyncpa [#allocation3], 0  ;;  %607 = vmatpush3.msra.mxu1 %v21_v0  ;;  %618 = vmatprep.subr.mxu0 %v692_v2  ;;  %v19_v4 = vld [vmem:[%s843_s2] sm:$0xff]  ;;  %vm102_vm2 = vcmask 130048   ;;  %v26_v6 = vld [vmem:[%s843_s2 + $0x38] sm:$0xff]  ;;  %vm186_vm3 = vcmask 261120  }
   0x3   :  { %609 = vmatmul.mubr.msk.f32.vlgmr.msra.gmra.mxu1 %vm28_vm0, %v18_v1  ;;  %611 = vmatprep.subr.mxu1 %v692_v2  ;;  %v746_v5 = vld [vmem:[%s841_s0] sm:$0xff]  ;;  %v25_v7 = vld [vmem:[%s843_s2 + $0x30] sm:$0xff]  ;;  %v24_v8 = vld [vmem:[%s843_s2 + $0x28] sm:$0xff]  ;;  %s694_s9 = smov 32   ;;  %vm261_vm4 = vcmask 1047808   ;;  %s695_s16 = smov 112  }
   0x4   :  { %612 = vmatpush3.msra.mxu1 %v20_v3  ;;  %615 = vmatprep.mubr.msk.f32.mxu1 %vm693_vm1, %v692_v2  ;;  %v23_v9 = vld [vmem:[%s843_s2 + $0x20] sm:$0xff]  ;;  %v567_v12 = vld [vmem:[%s843_s2 + $0x18] ss:$0 sm:$0xff]  ;;  %v571_v26 = vld [vmem:[%s843_s2 + $0x50] sm:$0xff]  ;;  %s696_s28 = smov 16   ;;  %s697_s29 = smov [#allocation2]  }
   0x5   :  { %613 = vmatprep.subr.mxu1 %v692_v2  ;;  %626 = vmatprep.mubr.msk.f32.mxu0 %vm693_vm1, %v692_v2  ;;  %v568_v18 = vld [vmem:[%s843_s2 + $0x40] ss:$0 sm:$0xff]  ;;  %v572_v25 = vld [vmem:[%s843_s2 + $0x58] sm:$0xff]  ;;  %v570_v31 = vld [vmem:[%s843_s2 + $0x48] sm:$0xff]  ;;  %s555_s30 = sshll.u32 %s697_s29, 4  ;;  %s556_s30 = int_to_ptr.vmem [resolvable:$true] %s555_s30 }
   0x6   :  { %614 = vmatpush3.msra.mxu1 %v19_v4  ;;  %619 = vmatpush3.msra.mxu0 %v26_v6  ;;  %v577_v39 = vld [vmem:[%s843_s2 + $0x80] sm:$0xff]  ;;  %v576_v40 = vld [vmem:[%s843_s2 + $0x78] sm:$0xff]  ;;  %v575_v41 = vld [vmem:[%s843_s2 + $0x70] sm:$0xff]  ;;  %s670_s5 = scalar_lea.vmem %s556_s30, 128  ;;  %p675_p1 = scmp.lt.s32.totalorder %s556_s30, %s556_s30 }
   0x7   :  { %616 = vmatmul.mubr.msk.f32.vlgmr.msra.gmra.mxu1 %vm102_vm2, %v746_v5  ;;  %629 = vmatprep.subr.mxu1 %v692_v2  ;;  %v574_v42 = vld [vmem:[%s843_s2 + $0x68] sm:$0xff]  ;;  %v581_v43 = vld [vmem:[%s843_s2 + $0x60] ss:$0 sm:$0xff]  ;;  %p671_p0 = scmp.ne.s32.totalorder %s556_s30, %s670_s5  ;;  %p676_p2 = scmp.lt.s32.totalorder %s670_s5, %s670_s5 }
   0x8   :  { %631 = vmatprep.mubr.msk.f32.mxu1 %vm693_vm1, %v692_v2  ;;  %620 = vmatprep.subr.mxu0 %v692_v2  ;;  %v582_v49 = vld [vmem:[%s843_s2 + $0x88] ss:$0 sm:$0xff] }
   0x9   :  { %621 = vmatpush3.msra.mxu0 %v25_v7  ;;  %630 = vmatpush3.msra.mxu1 %v572_v25  ;;  %p677_p3 = por %p676_p2, %p675_p1 }
   0xa   :  { %622 = vmatprep.subr.mxu0 %v692_v2  ;;  %634 = vmatprep.subr.mxu1 %v692_v2 }
   0xb   :  { %623 = vmatpush3.msra.mxu0 %v24_v8  ;;  %632 = vmatmul.mubr.msk.f32.vlgmr.msra.gmra.mxu1 %vm28_vm0, %v18_v1  ;;  %p678_p4 = pnand %p677_p3, %p671_p0 }
   0xc   :  { %624 = vmatprep.subr.mxu0 %v692_v2  ;;  %635 = vmatpush3.msra.mxu1 %v571_v26 }
   0xd   :  { %625 = vmatpush3.msra.mxu0 %v23_v9  ;;  %638 = vmatprep.mubr.msk.f32.mxu1 %vm693_vm1, %v692_v2 }
   0xe   :  { %641 = vmatprep.subr.mxu0 %v692_v2  ;;  %636 = vmatprep.subr.mxu1 %v692_v2 }
   0xf   :  { %637 = vmatpush3.msra.mxu1 %v570_v31 }
  0xc3   :  { %v98_v10 = vpop.f32.mrf.mxu1 }
  0xc5   :  { %v610_v11 = vpop.f32.mrf.mxu1 }
  0xc7   :  { %v172_v13 = vpop.f32.mrf.mxu1 }
  0xc8   :  { %v173_v14 = vadd.f32 %v172_v13, %v98_v10 }
  0xc9   :  { %v617_v15 = vpop.f32.mrf.mxu1 }
  0xca   :  { %v180_v16 = vadd.f32 %v567_v12, %v173_v14 }
  0xcb   :  { %v354_v34 = vpop.f32.mrf.mxu1 }
  0xcc   :  { %658 = vtanh.f32 %v180_v16 }
  0xcd   :  { %v633_v35 = vpop.f32.mrf.mxu1 }
  0xd9   :  { %v659_v17 = vpop.eup %658 }
  0xda   :  { %627 = vmatmul.mubr.msk.f32.vlgmr.msra.gmra.mxu0 %vm186_vm3, %v659_v17 }
  0xdb   :  { %649 = vmatprep.mubr.msk.f32.mxu0 %vm693_vm1, %v692_v2  ;;  %642 = vmatpush3.msra.mxu0 %v577_v39 }
  0xdc   :  { %643 = vmatprep.subr.mxu0 %v692_v2 }
  0xdd   :  { %644 = vmatpush3.msra.mxu0 %v576_v40 }
  0xde   :  { %645 = vmatprep.subr.mxu0 %v692_v2 }
  0xdf   :  { %646 = vmatpush3.msra.mxu0 %v575_v41 }
  0xe0   :  { %647 = vmatprep.subr.mxu0 %v692_v2 }
  0xe1   :  { %648 = vmatpush3.msra.mxu0 %v574_v42 }
 0x19a   :  { %v256_v19 = vpop.f32.mrf.mxu0 }
 0x19b   :  { %v257_v20 = vadd.f32 %v568_v18, %v256_v19 }
 0x19c   :  { %v628_v21 = vpop.f32.mrf.mxu0 }
 0x19d   :  { %660 = vtanh.f32 %v257_v20  ;;  %v268_v36 = vsub.f32 %v746_v5, %v257_v20 }
 0x1aa   :  { %v661_v22 = vpop.eup %660 }
 0x1ab   :  { %262 = vrot.lane.b32.xlu0 %v661_v22, %s694_s9 }
 0x21d   :  { %v263_v23 = vpop.permute.xlu0 %262 }
 0x21e   :  { %v264_v24 = vsel %vm261_vm4, %v263_v23, %v661_v22 }
 0x21f   :  { %265 = vrot.lane.b32.xlu0 %v264_v24, %s694_s9 }
 0x291   :  { %v266_v27 = vpop.permute.xlu0 %265 }
 0x292   :  { %v796_v28 = vsel %vm261_vm4, %v266_v27, %v661_v22 }
 0x293   :  { %v269_v29 = vsub.f32 0.0, %v796_v28 }
 0x295   :  { %v270_v30 = vmul.f32 1.442695, %v269_v29 }
 0x297   :  { %662 = vpow2.f32 %v270_v30 }
 0x2a4   :  { %v663_v32 = vpop.eup %662 }
 0x2a5   :  { %v272_v33 = vmul.f32 2.0, %v663_v32 }
 0x2a7   :  { %274 = vrot.lane.b32.xlu1 %v272_v33, %s695_s16 }
 0x319   :  { %v275_v37 = vpop.permute.xlu1 %274 }
 0x31a   :  { %v277_v38 = vmul.f32 %v275_v37, %v268_v36 }
 0x31c   :  { %639 = vmatmul.mubr.msk.f32.vlgmr.msra.gmra.mxu1 %vm102_vm2, %v277_v38 }
 0x3dc   :  { %v427_v44 = vpop.f32.mrf.mxu1 }
 0x3dd   :  { %v428_v45 = vadd.f32 %v427_v44, %v354_v34 }
 0x3de   :  { %v640_v46 = vpop.f32.mrf.mxu1 }
 0x3df   :  { %v435_v47 = vadd.f32 %v581_v43, %v428_v45 }
 0x3e1   :  { %664 = vtanh.f32 %v435_v47 }
 0x3ee   :  { %v665_v48 = vpop.eup %664 }
 0x3ef   :  { %650 = vmatmul.mubr.msk.f32.vlgmr.msra.gmra.mxu0 %vm186_vm3, %v665_v48 }
 0x4af   :  { %v510_v50 = vpop.f32.mrf.mxu0 }
 0x4b0   :  { %v511_v51 = vadd.f32 %v582_v49, %v510_v50 }
 0x4b1   :  { %v651_v52 = vpop.f32.mrf.mxu0 }
 0x4b2   :  { %666 = vtanh.f32 %v511_v51  ;;  %v521_v62 = vsub.f32 %v277_v38, %v511_v51 }
 0x4bf   :  { %v667_v53 = vpop.eup %666 }
 0x4c0   :  { %515 = vrot.lane.b32.xlu1 %v667_v53, %s694_s9 }
 0x532   :  { %v516_v54 = vpop.permute.xlu1 %515 }
 0x533   :  { %v517_v55 = vsel %vm261_vm4, %v516_v54, %v667_v53 }
 0x534   :  { %518 = vrot.lane.b32.xlu0 %v517_v55, %s694_s9 }
 0x5a6   :  { %v519_v56 = vpop.permute.xlu0 %518 }
 0x5a7   :  { %v520_v57 = vsel %vm261_vm4, %v519_v56, %v667_v53 }
 0x5a8   :  { %v522_v58 = vsub.f32 0.0, %v520_v57  ;;  %v531_v4 = vsub.f32 %v269_v29, %v520_v57 }
 0x5aa   :  { %v523_v59 = vmul.f32 1.442695, %v522_v58 }
 0x5ac   :  { %668 = vpow2.f32 %v523_v59 }
 0x5b9   :  { %v669_v60 = vpop.eup %668 }
 0x5ba   :  { %v525_v61 = vmul.f32 2.0, %v669_v60 }
 0x5bc   :  { %527 = vrot.lane.b32.xlu1 %v525_v61, %s695_s16 }
 0x62e   :  { %v528_v63 = vpop.permute.xlu1 %527 }
 0x62f   :  { %v530_v0 = vmul.f32 %v528_v63, %v521_v62 }
 0x631   :  { %v532_v1 = vmul.f32 -0.5, %v530_v0  ;;  %535 = vst.msk [vmem:[%s844_s3] sm:$0xff] %vm102_vm2, %v530_v0 }
 0x633   :  { %v533_v2 = vmul.f32 %v532_v1, %v530_v0 }
 0x635   :  { %v584_v3 = vadd.f32 -0.9189385, %v533_v2 }
 0x637   :  { %537 = vrot.lane.b32.xlu0 %v584_v3, %s696_s28 }
 0x6a9   :  { %v538_v5 = vpop.permute.xlu0 %537 }
 0x6aa   :  { %v540_v6 = vadd.f32 %v538_v5, %v531_v4 }
 0x6ac   :  { %v585_v7 = vadd.f32 1.3862944, %v540_v6 }
 0x6ae   :  { %543 = vrot.lane.b32.xlu1 %v585_v7, %s695_s16 }
 0x720   :  { %v544_v8 = vpop.permute.xlu1 %543 }
 0x721   :  { %546 = vst.msk [vmem:[#allocation2] sm:$0xff] %vm102_vm2, %v544_v8 }
 0x722   :  { %681 = shalt.err (!%p678_p4)
}
 0x723   :  { %558 = dma.vmem_to_hbm [thread:$0]  %s556_s30, 128, %s845_s4, [#allocation3]  }
 0x724   :  { %690 = dma.done.wait [#allocation3], 128  }
 0x725   :  { %691 = vsyncadd [#allocation3], 4294967168 }
 0x726   :  { %564 = vsyncpa [#allocation3], 1 }

</bundles_post_ra>
